<compile_context>
chip_gen: v7x
topology: tpu7x:2x2x1
jax: 0.10.0
libtpu: 0.0.40
codegen_flags: <defaults>
</compile_context>

<pallas_src>
import jax
import jax.numpy as jnp
from jax.experimental import pallas as pl
from jax.experimental.pallas import tpu as pltpu

_LANE = 128
_SUBLANE = 8


def _partial_l1_kernel(q_ref, p_ref, o_ref):
    # (block_rows, 128) tiles -> |q - p| in f32 -> (8, 128) partial-sum slab.
    q = q_ref[...].astype(jnp.float32)
    p = p_ref[...].astype(jnp.float32)
    d = jnp.abs(q - p)
    rows = d.shape[0]
    # Group rows 8-at-a-time; sum over groups is pure vreg-wise VALU adds.
    o_ref[...] = jnp.sum(d.reshape(rows // _SUBLANE, _SUBLANE, _LANE), axis=0)


def self_perceptual_loss(query, positive_key, ids=None, *, block_rows=4096):
    """Pallas implementation of selfPerceptualLoss.forward (ids is unused)."""
    assert query.shape == positive_key.shape
    assert query.ndim >= 1 and query.shape[0] > 0

    per_item_elems = 1
    for d in query.shape[1:]:
        per_item_elems *= int(d)
    n = int(query.shape[0]) * per_item_elems

    # ---- flatten to lane-dense (rows, 128); pad tail with zeros if needed ----
    rows_needed = pl.cdiv(n, _LANE)
    rows_needed = pl.cdiv(rows_needed, _SUBLANE) * _SUBLANE
    blk = max(_SUBLANE, (min(int(block_rows), rows_needed) // _SUBLANE) * _SUBLANE)
    padded_rows = pl.cdiv(rows_needed, blk) * blk
    padded_n = padded_rows * _LANE

    qf = query.reshape(-1)
    pf = positive_key.reshape(-1)
    if padded_n != n:
        # Zero padding contributes |0 - 0| = 0 to the sum.
        qf = jnp.pad(qf, (0, padded_n - n))
        pf = jnp.pad(pf, (0, padded_n - n))
    q2 = qf.reshape(padded_rows, _LANE)
    p2 = pf.reshape(padded_rows, _LANE)

    num_blocks = padded_rows // blk

    # VMEM budget: 2 inputs x 2 pipeline buffers x block, plus f32 temporaries
    # inside the body, plus headroom.  Clamp well under v7x's 64 MiB.
    in_block_bytes = blk * _LANE * q2.dtype.itemsize
    f32_block_bytes = blk * _LANE * 4
    needed = 4 * in_block_bytes + 6 * f32_block_bytes + (2 << 20)
    vmem_limit = int(min(max(needed, 16 << 20), 40 << 20))

    partials = pl.pallas_call(
        _partial_l1_kernel,
        out_shape=jax.ShapeDtypeStruct((num_blocks * _SUBLANE, _LANE), jnp.float32),
        grid_spec=pltpu.PrefetchScalarGridSpec(
            num_scalar_prefetch=0,
            grid=(num_blocks,),
            in_specs=[
                pl.BlockSpec((blk, _LANE), lambda i: (i, 0)),
                pl.BlockSpec((blk, _LANE), lambda i: (i, 0)),
            ],
            out_specs=pl.BlockSpec((_SUBLANE, _LANE), lambda i: (i, 0)),
        ),
        compiler_params=pltpu.CompilerParams(
            dimension_semantics=("parallel",),
            vmem_limit_bytes=vmem_limit,
        ),
    )(q2, p2)

    # One tiny final reduction + the shared 1/(C*H*W) scale, outside the kernel.
    return jnp.sum(partials) / jnp.float32(per_item_elems)


def _reference(query, positive_key):
    # Plain-JAX reference of the PyTorch loop, for a sanity check.
    per_item = jnp.mean(
        jnp.abs(query.astype(jnp.float32) - positive_key.astype(jnp.float32)),
        axis=tuple(range(1, query.ndim)),
    )
    return jnp.sum(per_item)


if __name__ == "__main__":
    key = jax.random.PRNGKey(0)
    kq, kp = jax.random.split(key)
    B, C, H, W = 2, 4, 16, 16
    query = jax.random.normal(kq, (B, C, H, W), dtype=jnp.float32)
    positive_key = jax.random.normal(kp, (B, C, H, W), dtype=jnp.float32)
    ids = jnp.arange(B, dtype=jnp.int32)  # unused by the forward pass

    loss = self_perceptual_loss(query, positive_key, ids)
    loss = jax.block_until_ready(loss)

    ref = jax.block_until_ready(_reference(query, positive_key))
    assert jnp.allclose(loss, ref, rtol=1e-5, atol=1e-5), (loss, ref)

    print("KERNEL_OK")
</pallas_src>

<mosaic_0001>
module attributes {stable_mosaic.version = 11 : i64} {
  func.func @_partial_l1_kernel(%arg0: i32, %arg1: memref<16x128xf32, #tpu.memory_space<vmem>>, %arg2: memref<16x128xf32, #tpu.memory_space<vmem>>, %arg3: memref<8x128xf32, #tpu.memory_space<vmem>>) attributes {dimension_semantics = [#tpu.dimension_semantics<parallel>], iteration_bounds = array<i64: 1>, scalar_prefetch = 0 : i64, scratch_operands = 0 : i64, tpu.core_type = #tpu.core_type<tc>, window_params = [{transform_indices = @transform_0, window_bounds = array<i64: 16, 128>}, {transform_indices = @transform_1, window_bounds = array<i64: 16, 128>}, {transform_indices = @transform_2, window_bounds = array<i64: 8, 128>}]} {
    %c0 = arith.constant 0 : index
    %c0_0 = arith.constant 0 : index
    %0 = vector.load %arg1[%c0, %c0_0] : memref<16x128xf32, #tpu.memory_space<vmem>>, vector<16x128xf32>
    %c0_1 = arith.constant 0 : index
    %c0_2 = arith.constant 0 : index
    %1 = vector.load %arg2[%c0_1, %c0_2] : memref<16x128xf32, #tpu.memory_space<vmem>>, vector<16x128xf32>
    %2 = arith.subf %0, %1 : vector<16x128xf32>
    %3 = math.absf %2 : vector<16x128xf32>
    %4 = vector.shape_cast %3 : vector<16x128xf32> to vector<2x8x128xf32>
    %cst = arith.constant dense<0.000000e+00> : vector<8x128xf32>
    %5 = vector.multi_reduction <add>, %4, %cst [0] : vector<2x8x128xf32> to vector<8x128xf32>
    %c0_3 = arith.constant 0 : index
    %c0_4 = arith.constant 0 : index
    %6 = vector.load %arg3[%c0_3, %c0_4] : memref<8x128xf32, #tpu.memory_space<vmem>>, vector<8x128xf32>
    tpu.vector_store %arg3[%c0_3, %c0_4], %5 {strides = array<i32>} : memref<8x128xf32, #tpu.memory_space<vmem>>, vector<8x128xf32>,
    return
  }
  func.func @transform_0(%arg0: i32) -> (i32, i32) {
    %c0_i32 = arith.constant 0 : i32
    %c0_i32_0 = arith.constant 0 : i32
    return %arg0, %c0_i32 : i32, i32
  }
  func.func @transform_1(%arg0: i32) -> (i32, i32) {
    %c0_i32 = arith.constant 0 : i32
    %c0_i32_0 = arith.constant 0 : i32
    return %arg0, %c0_i32 : i32, i32
  }
  func.func @transform_2(%arg0: i32) -> (i32, i32) {
    %c0_i32 = arith.constant 0 : i32
    %c0_i32_0 = arith.constant 0 : i32
    return %arg0, %c0_i32 : i32, i32
  }
}

</mosaic_0001>

<bundles_post_ra>
// kernel: tpu_custom_call.1
= control target key start
LH: loop header
LB: loop body
LE: loop exit
PB: predicated region body
PF: predicated region fallthrough
CT: control target
= control target key end

     0   :  { %7 = vsyncpa [#allocation3], 0  ;;  %s199_s0 = inlined_call_operand.hbm [shape: f32[16,128], index: 0, kind: input, shape index: {}]   ;;  %s200_s1 = inlined_call_operand.hbm [shape: f32[16,128], index: 1, kind: input, shape index: {}]   ;;  %s201_s2 = inlined_call_operand.hbm [shape: f32[8,128], index: 2, kind: output, shape index: {}]  }
   0x1   :  { %8 = vsyncpa [#allocation6], 0 }
   0x2   :  { %9 = vsyncpa [#allocation4], 0  ;;  %s143_s9 = smov [#allocation2]   ;;  %s71_s13 = scalar_lea.hbm %s199_s0, 256 }
   0x3   :  { %s15_s10 = sshll.u32 %s143_s9, 4  ;;  %p72_p0 = scmp.ne.s32.totalorder %s199_s0, %s71_s13  ;;  %s16_s10 = int_to_ptr.vmem [resolvable:$true] %s15_s10 }
   0x4   :  { %p75_p1 = scmp.lt.u32.totalorder %s71_s13, %s199_s0 }
   0x6   :  { %p77_p2 = pnand %p75_p1, %p72_p0 }
   0x8   :  { %80 = shalt.err (!%p77_p2)
}
   0x9   :  { %s81_s18 = scalar_lea.vmem %s16_s10, 256  ;;  %p86_p4 = scmp.lt.s32.totalorder %s16_s10, %s16_s10 }
   0xa   :  { %p82_p3 = scmp.ne.s32.totalorder %s16_s10, %s81_s18  ;;  %p87_p5 = scmp.lt.s32.totalorder %s81_s18, %s81_s18 }
   0xc   :  { %p88_p6 = por %p87_p5, %p86_p4 }
   0xe   :  { %p89_p7 = pnand %p88_p6, %p82_p3 }
  0x10   :  { %92 = shalt.err (!%p89_p7)
}
  0x11   :  { %s144_s19 = smov 128   ;;  %s145_s20 = smov 8  }
  0x12   :  { %21 = dma.hbm_to_vmem [thread:$0]  %s199_s0, 256, %s16_s10, [#allocation3], %s144_s19, %s144_s19, %s145_s20  }
  0x13   :  { %s146_s23 = smov [#allocation5]   ;;  %s93_s27 = scalar_lea.hbm %s200_s1, 256 }
  0x14   :  { %s27_s24 = sshll.u32 %s146_s23, 4  ;;  %p94_p8 = scmp.ne.s32.totalorder %s200_s1, %s93_s27  ;;  %s28_s24 = int_to_ptr.vmem [resolvable:$true] %s27_s24 }
  0x15   :  { %p97_p9 = scmp.lt.u32.totalorder %s93_s27, %s200_s1 }
  0x17   :  { %p99_p10 = pnand %p97_p9, %p94_p8 }
  0x19   :  { %102 = shalt.err (!%p99_p10)
}
  0x1a   :  { %s103_s4 = scalar_lea.vmem %s28_s24, 256  ;;  %p108_p12 = scmp.lt.s32.totalorder %s28_s24, %s28_s24 }
  0x1b   :  { %p104_p11 = scmp.ne.s32.totalorder %s28_s24, %s103_s4  ;;  %p109_p13 = scmp.lt.s32.totalorder %s103_s4, %s103_s4 }
  0x1d   :  { %p110_p0 = por %p109_p13, %p108_p12 }
  0x1f   :  { %p111_p1 = pnand %p110_p0, %p104_p11 }
  0x21   :  { %114 = shalt.err (!%p111_p1)
}
  0x22   :  { %33 = dma.hbm_to_vmem [thread:$0]  %s200_s1, 256, %s28_s24, [#allocation6], %s144_s19, %s144_s19, %s145_s20  }
  0x23   :  { %137 = dma.done.wait [#allocation3], 256  }
  0x24   :  { %138 = vsyncadd [#allocation3], 4294967040 }
  0x25   :  { %139 = dma.done.wait [#allocation6], 256  }
  0x26   :  { %140 = vsyncadd [#allocation6], 4294967040  ;;  %v40_v0 = vld [vmem:[#allocation2] sm:$0xff]  ;;  %v41_v1 = vld [vmem:[#allocation2 + $0x8] sm:$0xff]  ;;  %s147_s6 = smov [#allocation7]  }
  0x27   :  { %v42_v2 = vld [vmem:[#allocation5] sm:$0xff]  ;;  %v43_v3 = vld [vmem:[#allocation5 + $0x8] sm:$0xff]  ;;  %s56_s7 = sshll.u32 %s147_s6, 4  ;;  %s57_s7 = int_to_ptr.vmem [resolvable:$true] %s56_s7 }
  0x28   :  { %v44_v4 = vsub.f32 %v40_v0, %v42_v2  ;;  %v45_v5 = vsub.f32 %v41_v1, %v43_v3  ;;  %s115_s8 = scalar_lea.vmem %s57_s7, 128  ;;  %p120_p3 = scmp.lt.s32.totalorder %s57_s7, %s57_s7 }
  0x29   :  { %p116_p2 = scmp.ne.s32.totalorder %s57_s7, %s115_s8  ;;  %p121_p4 = scmp.lt.s32.totalorder %s115_s8, %s115_s8 }
  0x2a   :  { %v46_v6 = vand.u32 2147483647, %v44_v4  ;;  %v47_v7 = vand.u32 2147483647, %v45_v5 }
  0x2b   :  { %p122_p5 = por %p121_p4, %p120_p3 }
  0x2c   :  { %v48_v8 = vadd.f32 %v47_v7, %v46_v6 }
  0x2d   :  { %p123_p6 = pnand %p122_p5, %p116_p2 }
  0x2e   :  { %49 = vst [vmem:[#allocation7] sm:$0xff] %v48_v8 }
  0x2f   :  { %126 = shalt.err (!%p123_p6)
}
  0x30   :  { %s127_s10 = scalar_lea.hbm %s201_s2, 128 }
  0x31   :  { %p128_p7 = scmp.ne.s32.totalorder %s201_s2, %s127_s10  ;;  %p131_p8 = scmp.lt.u32.totalorder %s127_s10, %s201_s2 }
  0x33   :  { %p133_p9 = pnand %p131_p8, %p128_p7 }
  0x35   :  { %136 = shalt.err (!%p133_p9)
}
  0x36   :  { %59 = dma.vmem_to_hbm [thread:$0]  %s57_s7, 128, %s201_s2, [#allocation4]  }
  0x37   :  { %141 = dma.done.wait [#allocation4], 128  }
  0x38   :  { %142 = vsyncadd [#allocation4], 4294967168 }
  0x39   :  { %63 = vsyncpa [#allocation3], 1 }
  0x3a   :  { %64 = vsyncpa [#allocation6], 1 }
  0x3b   :  { %65 = vsyncpa [#allocation4], 1 }

</bundles_post_ra>
